<compile_context>
chip_gen: v7x
topology: tpu7x:2x2x1
jax: 0.10.0
libtpu: 0.0.40
codegen_flags: <defaults>
</compile_context>

<pallas_src>
import jax
import jax.numpy as jnp
from jax.experimental import pallas as pl
from jax.experimental.pallas import tpu as pltpu


def _packed_linear_relu_kernel(xp_ref, wbd_ref, bp_ref, op_ref):
    # xp_ref : (TR, 128)  -- 16 samples packed per row (lane-dense)
    # wbd_ref: (128, 128) -- block-diagonal weight, resident across grid steps
    # bp_ref : (1, 128)   -- bias tiled over the 16 sample slots
    # op_ref : (TR, 128)  -- lane-dense output tile
    y = jnp.dot(xp_ref[...], wbd_ref[...], preferred_element_type=jnp.float32)
    y = y + bp_ref[...]
    op_ref[...] = jnp.maximum(y, 0.0).astype(op_ref.dtype)


def linear_relu(x, w, b, *, row_tile=2048, min_pallas_batch=1024,
                force_pallas=False):
    """y = relu(x @ w + b).  x: (B, 8), w: (8, 8) (in, out), b: (8,)."""
    B, IN = x.shape
    OUT = w.shape[1]

    # Tiny batches are 100% launch/DMA overhead for a standalone kernel; let
    # XLA's fused small-dot path handle them unless the caller forces Pallas.
    if not force_pallas and B < min_pallas_batch:
        return jnp.maximum(x @ w + b, 0.0)

    PACK = 128 // IN                      # 16 samples per 128-lane row
    LANES = PACK * IN                     # 128

    # Pad batch to a multiple of 16 rows (<= 15 rows, <1 KB), then the reshape
    # to (R, 128) is a free row-major view; padded rows only produce discarded
    # output rows (no cross-row mixing in a block-diagonal matmul).
    Bp = ((B + PACK - 1) // PACK) * PACK
    if Bp != B:
        x = jnp.pad(x, ((0, Bp - B), (0, 0)))
    R = Bp // PACK
    x_packed = x.reshape(R, LANES)

    # 128x128 block-diagonal weight (16 copies of W) and 128-lane tiled bias.
    # In a real model these 64 KB constants would be built once, not per call.
    w_bd = jnp.kron(jnp.eye(PACK, dtype=w.dtype), w)        # (128, 128)
    b_packed = jnp.tile(b, PACK).reshape(1, PACK * OUT)     # (1, 128)

    # Row tile: ~1 MB payload per step, capped at ceil(R/2) (rounded to 8) so
    # large problems always yield >= 2 grid steps for v7x megacore sharding.
    if R <= 8:
        TR = R                            # block == full array, no padding rule issue
    else:
        half = ((-(-R // 2)) + 7) // 8 * 8
        TR = max(8, min(row_tile, half))
    grid = (pl.cdiv(R, TR),)

    out_packed = pl.pallas_call(
        _packed_linear_relu_kernel,
        out_shape=jax.ShapeDtypeStruct((R, LANES), x.dtype),
        grid=grid,
        in_specs=[
            pl.BlockSpec((TR, LANES), lambda i: (i, 0)),      # stream packed x
            pl.BlockSpec((LANES, LANES), lambda i: (0, 0)),   # W resident
            pl.BlockSpec((1, LANES), lambda i: (0, 0)),       # b resident
        ],
        out_specs=pl.BlockSpec((TR, LANES), lambda i: (i, 0)),
        compiler_params=pltpu.CompilerParams(
            dimension_semantics=("parallel",),                # v7x: 2 TCs share batch
        ),
    )(x_packed, w_bd, b_packed)

    # Free row-major view back to (B, 8).
    return out_packed.reshape(Bp, OUT)[:B]


if __name__ == "__main__":
    key = jax.random.PRNGKey(0)
    kx, kw, kb, kx2 = jax.random.split(key, 4)

    # Deterministic Linear(8, 8) params (PyTorch-style uniform(-1/sqrt(8), 1/sqrt(8))).
    bound = 1.0 / jnp.sqrt(8.0)
    w_torch = jax.random.uniform(kw, (8, 8), minval=-bound, maxval=bound,
                                 dtype=jnp.float32)   # PyTorch stores (out, in)
    w = w_torch.T                                      # (in, out) so forward is x @ w
    b = jax.random.uniform(kb, (8,), minval=-bound, maxval=bound,
                           dtype=jnp.float32)

    # Spec-sized input (1, 8): force the Pallas path to validate the kernel.
    x1 = jax.random.normal(kx, (1, 8), dtype=jnp.float32)
    out1 = linear_relu(x1, w, b, force_pallas=True)
    jax.block_until_ready(out1)
    ref1 = jnp.maximum(x1 @ w + b, 0.0)
    assert out1.shape == (1, 8)
    assert jnp.allclose(out1, ref1, atol=1e-5), "mismatch vs reference (B=1)"

    # Larger batch: exercises the multi-step lane-dense streamed path
    # (B=4096 -> R=256 packed rows -> TR=128 -> grid=(2,)).
    xb = jax.random.normal(kx2, (4096, 8), dtype=jnp.float32)
    outb = linear_relu(xb, w, b, force_pallas=True)
    jax.block_until_ready(outb)
    refb = jnp.maximum(xb @ w + b, 0.0)
    assert outb.shape == (4096, 8)
    assert jnp.allclose(outb, refb, atol=1e-5), "mismatch vs reference (B=4096)"

    print("KERNEL_OK")
</pallas_src>

<mosaic_0001>
module attributes {stable_mosaic.version = 11 : i64} {
  func.func @_packed_linear_relu_kernel(%arg0: i32, %arg1: memref<1x128xf32, #tpu.memory_space<vmem>>, %arg2: memref<128x128xf32, #tpu.memory_space<vmem>>, %arg3: memref<1x128xf32, #tpu.memory_space<vmem>>, %arg4: memref<1x128xf32, #tpu.memory_space<vmem>>) attributes {dimension_semantics = [#tpu.dimension_semantics<parallel>], iteration_bounds = array<i64: 1>, scalar_prefetch = 0 : i64, scratch_operands = 0 : i64, tpu.core_type = #tpu.core_type<tc>, window_params = [{transform_indices = @transform_0, window_bounds = array<i64: 1, 128>}, {pipeline_mode = #tpu.pipeline_mode<synchronous>, transform_indices = @transform_1, window_bounds = array<i64: 128, 128>}, {pipeline_mode = #tpu.pipeline_mode<synchronous>, transform_indices = @transform_2, window_bounds = array<i64: 1, 128>}, {transform_indices = @transform_3, window_bounds = array<i64: 1, 128>}]} {
    %c0 = arith.constant 0 : index
    %c0_0 = arith.constant 0 : index
    %0 = vector.load %arg1[%c0, %c0_0] : memref<1x128xf32, #tpu.memory_space<vmem>>, vector<1x128xf32>
    %c0_1 = arith.constant 0 : index
    %c0_2 = arith.constant 0 : index
    %1 = vector.load %arg2[%c0_1, %c0_2] : memref<128x128xf32, #tpu.memory_space<vmem>>, vector<128x128xf32>
    %cst = arith.constant dense<0.000000e+00> : vector<1x128xf32>
    %2 = tpu.matmul %0, %1, %cst {dimension_numbers = #tpu.dot_dimension_numbers<[1], [0], [0], [1], [0, 0, 1, 1], [], []>} : vector<1x128xf32>, vector<128x128xf32>, vector<1x128xf32> -> vector<1x128xf32>
    %c0_3 = arith.constant 0 : index
    %c0_4 = arith.constant 0 : index
    %3 = vector.load %arg3[%c0_3, %c0_4] : memref<1x128xf32, #tpu.memory_space<vmem>>, vector<1x128xf32>
    %4 = arith.addf %2, %3 : vector<1x128xf32>
    %cst_5 = arith.constant 0.000000e+00 : f32
    %5 = vector.broadcast %cst_5 : f32 to vector<1x128xf32>
    %6 = arith.maximumf %4, %5 : vector<1x128xf32>
    %c0_6 = arith.constant 0 : index
    %c0_7 = arith.constant 0 : index
    %7 = vector.load %arg4[%c0_6, %c0_7] : memref<1x128xf32, #tpu.memory_space<vmem>>, vector<1x128xf32>
    tpu.vector_store %arg4[%c0_6, %c0_7], %6 {strides = array<i32>} : memref<1x128xf32, #tpu.memory_space<vmem>>, vector<1x128xf32>,
    return
  }
  func.func @transform_0(%arg0: i32) -> (i32, i32) {
    %c0_i32 = arith.constant 0 : i32
    %c0_i32_0 = arith.constant 0 : i32
    return %arg0, %c0_i32 : i32, i32
  }
  func.func @transform_1(%arg0: i32) -> (i32, i32) {
    %c0_i32 = arith.constant 0 : i32
    %c0_i32_0 = arith.constant 0 : i32
    %c0_i32_1 = arith.constant 0 : i32
    return %c0_i32, %c0_i32_0 : i32, i32
  }
  func.func @transform_2(%arg0: i32) -> (i32, i32) {
    %c0_i32 = arith.constant 0 : i32
    %c0_i32_0 = arith.constant 0 : i32
    %c0_i32_1 = arith.constant 0 : i32
    return %c0_i32, %c0_i32_0 : i32, i32
  }
  func.func @transform_3(%arg0: i32) -> (i32, i32) {
    %c0_i32 = arith.constant 0 : i32
    %c0_i32_0 = arith.constant 0 : i32
    return %arg0, %c0_i32 : i32, i32
  }
}

</mosaic_0001>

<bundles_post_ra>
// kernel: tpu_custom_call.1
= control target key start
LH: loop header
LB: loop body
LE: loop exit
PB: predicated region body
PF: predicated region fallthrough
CT: control target
= control target key end

     0   :  { %8 = vsyncpa [#allocation3], 0  ;;  %s377_s0 = inlined_call_operand.hbm [shape: f32[1,128], index: 0, kind: input, shape index: {}]   ;;  %s378_s1 = inlined_call_operand.hbm [shape: f32[128,128], index: 1, kind: input, shape index: {}]   ;;  %s379_s2 = inlined_call_operand.vmem [shape: f32[1,128], index: 2, kind: input, shape index: {}]   ;;  %s380_s3 = inlined_call_operand.hbm [shape: f32[1,128], index: 3, kind: output, shape index: {}]  }
   0x1   :  { %9 = vsyncpa [#allocation6], 0 }
   0x2   :  { %10 = vsyncpa [#allocation4], 0  ;;  %s303_s12 = smov [#allocation2]   ;;  %s304_s14 = smov [#allocation5]  }
   0x3   :  { %s17_s13 = sshll.u32 %s303_s12, 4  ;;  %s26_s15 = sshll.u32 %s304_s14, 4  ;;  %s18_s13 = int_to_ptr.vmem [resolvable:$true] %s17_s13  ;;  %s331_s15 = int_to_ptr.vmem [resolvable:$true] %s26_s15 }
   0x4   :  { %s231_s18 = scalar_lea.hbm %s377_s0, 16 }
   0x5   :  { %p232_p0 = scmp.ne.s32.totalorder %s377_s0, %s231_s18  ;;  %p235_p1 = scmp.lt.u32.totalorder %s231_s18, %s377_s0 }
   0x7   :  { %p237_p2 = pnand %p235_p1, %p232_p0 }
   0x9   :  { %240 = shalt.err (!%p237_p2)
}
   0xa   :  { %s241_s23 = scalar_lea.vmem %s18_s13, 16  ;;  %s245_s24 = scalar_lea.vmem %s18_s13, 32 }
   0xb   :  { %p242_p3 = scmp.ne.s32.totalorder %s18_s13, %s241_s23  ;;  %p246_p4 = scmp.lt.s32.totalorder %s18_s13, %s18_s13 }
   0xc   :  { %p247_p5 = scmp.lt.s32.totalorder %s245_s24, %s241_s23 }
   0xe   :  { %p248_p6 = por %p247_p5, %p246_p4 }
  0x10   :  { %p249_p7 = pnand %p248_p6, %p242_p3 }
  0x12   :  { %252 = shalt.err (!%p249_p7)
}
  0x13   :  { %20 = dma.hbm_to_vmem [thread:$0]  %s377_s0, 16, %s18_s13, [#allocation3]  }
  0x14   :  { %s253_s29 = scalar_lea.hbm %s378_s1, 2048 }
  0x15   :  { %p254_p8 = scmp.ne.s32.totalorder %s378_s1, %s253_s29  ;;  %p257_p9 = scmp.lt.u32.totalorder %s253_s29, %s378_s1 }
  0x17   :  { %p259_p10 = pnand %p257_p9, %p254_p8 }
  0x19   :  { %262 = shalt.err (!%p259_p10)
}
  0x1a   :  { %s263_s7 = scalar_lea.vmem %s331_s15, 2048  ;;  %p268_p12 = scmp.lt.s32.totalorder %s331_s15, %s331_s15 }
  0x1b   :  { %p264_p11 = scmp.ne.s32.totalorder %s331_s15, %s263_s7  ;;  %p269_p13 = scmp.lt.s32.totalorder %s263_s7, %s263_s7 }
  0x1d   :  { %p270_p0 = por %p269_p13, %p268_p12 }
  0x1f   :  { %p271_p1 = pnand %p270_p0, %p264_p11 }
  0x21   :  { %274 = shalt.err (!%p271_p1)
}
  0x22   :  { %s305_s0 = smov 128   ;;  %s306_s8 = smov 8  }
  0x23   :  { %32 = dma.hbm_to_vmem [thread:$0]  %s378_s1, 2048, %s331_s15, [#allocation6], %s305_s0, %s305_s0, %s306_s8  }
  0x24   :  { %297 = dma.done.wait [#allocation3], 16  }
  0x25   :  { %298 = vsyncadd [#allocation3], 4294967280 }
  0x26   :  { %299 = dma.done.wait [#allocation6], 2048  }
  0x27   :  { %300 = vsyncadd [#allocation6], 4294965248  ;;  %v307_v0 = vmov 0.0|0.0   ;;  %vm308_vm0 = vmmov 0   ;;  %v309_v1 = vmov 0.0   ;;  %v42_v2 = vld [vmem:[#allocation5] sm:$0xff] }
  0x28   :  { %199 = vmatprep.subr.bf16.mxu0 %v307_v0  ;;  %196 = vmatprep.mubr.msk.f32.mxu0 %vm308_vm0, %v309_v1  ;;  %v43_v3 = vld [vmem:[#allocation5 + $0x8] sm:$0xff]  ;;  %v44_v4 = vld [vmem:[#allocation5 + $0x10] sm:$0xff]  ;;  %v45_v6 = vld [vmem:[#allocation5 + $0x18] sm:$0xff]  ;;  %s310_s12 = smov [#allocation7]  }
  0x29   :  { %v200_v5 = vpack.c.bf16 %v43_v3, %v42_v2  ;;  %v203_v7 = vpack.c.bf16 %v45_v6, %v44_v4  ;;  %v46_v8 = vld [vmem:[#allocation5 + $0x20] sm:$0xff]  ;;  %v47_v9 = vld [vmem:[#allocation5 + $0x28] sm:$0xff]  ;;  %v48_v11 = vld [vmem:[#allocation5 + $0x30] sm:$0xff]  ;;  %s137_s13 = sshll.u32 %s310_s12, 4  ;;  %s138_s13 = int_to_ptr.vmem [resolvable:$true] %s137_s13 }
  0x2a   :  { %v206_v10 = vpack.c.bf16 %v47_v9, %v46_v8  ;;  %v49_v12 = vld [vmem:[#allocation5 + $0x38] sm:$0xff]  ;;  %v50_v14 = vld [vmem:[#allocation5 + $0x40] sm:$0xff]  ;;  %v51_v15 = vld [vmem:[#allocation5 + $0x48] sm:$0xff]  ;;  %s275_s14 = scalar_lea.vmem %s138_s13, 16  ;;  %s279_s15 = scalar_lea.vmem %s138_s13, 32 }
  0x2b   :  { %201 = vmatpush3.bf16.msra.mxu0 %v200_v5  ;;  %v209_v13 = vpack.c.bf16 %v49_v12, %v48_v11  ;;  %v212_v16 = vpack.c.bf16 %v51_v15, %v50_v14  ;;  %v52_v17 = vld [vmem:[#allocation5 + $0x50] sm:$0xff]  ;;  %v53_v18 = vld [vmem:[#allocation5 + $0x58] sm:$0xff]  ;;  %v54_v20 = vld [vmem:[#allocation5 + $0x60] sm:$0xff]  ;;  %p276_p2 = scmp.ne.s32.totalorder %s138_s13, %s275_s14  ;;  %p280_p3 = scmp.lt.s32.totalorder %s138_s13, %s138_s13 }
  0x2c   :  { %202 = vmatprep.subr.bf16.mxu0 %v307_v0  ;;  %v215_v19 = vpack.c.bf16 %v53_v18, %v52_v17  ;;  %v55_v21 = vld [vmem:[#allocation5 + $0x68] sm:$0xff]  ;;  %v56_v23 = vld [vmem:[#allocation5 + $0x70] sm:$0xff]  ;;  %v57_v24 = vld [vmem:[#allocation5 + $0x78] sm:$0xff]  ;;  %p281_p4 = scmp.lt.s32.totalorder %s279_s15, %s275_s14 }
  0x2d   :  { %v218_v22 = vpack.c.bf16 %v55_v21, %v54_v20  ;;  %v221_v25 = vpack.c.bf16 %v57_v24, %v56_v23  ;;  %v41_v26 = vld [vmem:[#allocation2] sm:$0x1] }
  0x2e   :  { %v58_v27 = vld [vmem:[%s379_s2] sm:$0x1]  ;;  %p282_p5 = por %p281_p4, %p280_p3 }
  0x2f   :  { %204 = vmatpush3.bf16.msra.mxu0 %v203_v7 }
  0x30   :  { %205 = vmatprep.subr.bf16.mxu0 %v307_v0  ;;  %p283_p6 = pnand %p282_p5, %p276_p2 }
  0x33   :  { %207 = vmatpush3.bf16.msra.mxu0 %v206_v10 }
  0x34   :  { %208 = vmatprep.subr.bf16.mxu0 %v307_v0 }
  0x37   :  { %210 = vmatpush3.bf16.msra.mxu0 %v209_v13 }
  0x38   :  { %211 = vmatprep.subr.bf16.mxu0 %v307_v0 }
  0x3b   :  { %213 = vmatpush3.bf16.msra.mxu0 %v212_v16 }
  0x3c   :  { %214 = vmatprep.subr.bf16.mxu0 %v307_v0 }
  0x3f   :  { %216 = vmatpush3.bf16.msra.mxu0 %v215_v19 }
  0x40   :  { %217 = vmatprep.subr.bf16.mxu0 %v307_v0 }
  0x43   :  { %219 = vmatpush3.bf16.msra.mxu0 %v218_v22 }
  0x44   :  { %220 = vmatprep.subr.bf16.mxu0 %v307_v0 }
  0x47   :  { %222 = vmatpush3.bf16.msra.mxu0 %v221_v25 }
  0x4a   :  { %197 = vmatmul.mubr.f32.vlgmr.msra.gmra.mrb[0].mxu0 %v41_v26 }
 0x11d   :  { %v125_v28 = vpop.f32.mrb[0].mxu0 }
 0x11e   :  { %v126_v29 = vadd.f32 %v125_v28, %v58_v27  ;;  %v198_v30 = vpop.f32.mrb[1].mxu0 }
 0x120   :  { %v129_v31 = vmax.f32 %v126_v29, 0.0 }
 0x122   :  { %130 = vst [vmem:[#allocation7] sm:$0x1] %v129_v31 }
 0x123   :  { %286 = shalt.err (!%p283_p6)
}
 0x124   :  { %s287_s2 = scalar_lea.hbm %s380_s3, 16 }
 0x125   :  { %p288_p7 = scmp.ne.s32.totalorder %s380_s3, %s287_s2  ;;  %p291_p8 = scmp.lt.u32.totalorder %s287_s2, %s380_s3 }
 0x127   :  { %p293_p9 = pnand %p291_p8, %p288_p7 }
 0x129   :  { %296 = shalt.err (!%p293_p9)
}
 0x12a   :  { %140 = dma.vmem_to_hbm [thread:$0]  %s138_s13, 16, %s380_s3, [#allocation4]  }
 0x12b   :  { %301 = dma.done.wait [#allocation4], 16  }
 0x12c   :  { %302 = vsyncadd [#allocation4], 4294967280 }
 0x12d   :  { %144 = vsyncpa [#allocation3], 1 }
 0x12e   :  { %145 = vsyncpa [#allocation6], 1 }
 0x12f   :  { %146 = vsyncpa [#allocation4], 1 }

</bundles_post_ra>
